<compile_context>
chip_gen: v7x
topology: tpu7x:2x2x1
jax: 0.10.0
libtpu: 0.0.40
codegen_flags: <defaults>
</compile_context>

<pallas_src>
import functools

import jax
import jax.numpy as jnp
from jax import lax
from jax.experimental import pallas as pl
from jax.experimental.pallas import tpu as pltpu


def _round_up(n, m):
    return ((n + m - 1) // m) * m


def _vmem_capacity_bytes():
    """Physical VMEM per core (gen-aware), with a conservative fallback."""
    try:
        info = pltpu.get_tpu_info()
        cap = getattr(info, "vmem_capacity_bytes", None)
        if cap:
            return int(cap)
    except Exception:
        pass
    return 64 * 1024 * 1024  # conservative default (v7x per-core VMEM)


def _resnet_chunk_kernel(x_ref, w_ref, b_ref, o_ref, *, h, chunk, unroll, activation):
    """One grid step = `chunk` residual layers applied to one batch tile.

    x_ref: (bt, W) f32         input batch tile (read only at the first depth step)
    w_ref: (chunk, W, W)       this chunk's weights, already in (in, out) layout
    b_ref: (chunk, 1, W) f32   this chunk's biases
    o_ref: (bt, W) f32         running state (output block, VMEM-resident across depth)
    """
    @pl.when(pl.program_id(1) == 0)
    def _():
        o_ref[...] = x_ref[...].astype(o_ref.dtype)

    def layer(l, x):
        # x @ W_l.T in the original (out, in) layout == x @ Wt_l with Wt pre-transposed
        # to (in, out) in the wrapper -> no per-layer XLU transpose inside the kernel.
        z = lax.dot_general(
            x.astype(w_ref.dtype), w_ref[l],
            dimension_numbers=(((1,), (0,)), ((), ())),
            preferred_element_type=jnp.float32,
        )
        z = z + b_ref[l]                      # (1, W) broadcasts over the batch tile
        return x + h * activation(z)

    o_ref[...] = lax.fori_loop(0, chunk, layer, o_ref[...], unroll=unroll)


def resnet_forward(x, w_stack, b_stack, h, *, activation=jnp.tanh,
                   weight_dtype=jnp.bfloat16, max_chunk=None):
    """x: (B, width); w_stack: (depth, width, width) in PyTorch (out, in) layout;
    b_stack: (depth, width). Returns (B, width) float32.

    NOTE: depth/width padding relies on activation(0) == 0 (true for tanh/relu).
    Set weight_dtype=jnp.float32 to disable the bf16 weight quantization at very
    large depth.
    """
    batch, width = x.shape
    depth = w_stack.shape[0]
    assert w_stack.shape == (depth, width, width)
    assert b_stack.shape == (depth, width)

    # ---- layout prep (in production, done ONCE at weight-load time, not per call) ----
    w_t = jnp.transpose(w_stack, (0, 2, 1)).astype(weight_dtype)   # (depth, in, out)
    b_f = b_stack.astype(jnp.float32).reshape(depth, 1, width)
    x_f = x.astype(jnp.float32)

    # ---- pad to TPU-friendly shapes: batch -> x8, width -> x128 ----
    width_p = _round_up(width, 128)
    batch_p = _round_up(batch, 8)
    # Batch tiling: large batches get a leading "parallel" grid axis (dual TC on v7x);
    # small batches stay a single tile (avoid re-streaming weights when DMA-bound).
    if batch_p > 256:
        bt = 256
        batch_p = _round_up(batch_p, bt)
    else:
        bt = batch_p

    if width_p != width:
        w_t = jnp.pad(w_t, ((0, 0), (0, width_p - width), (0, width_p - width)))
        b_f = jnp.pad(b_f, ((0, 0), (0, 0), (0, width_p - width)))
    if width_p != width or batch_p != batch:
        x_f = jnp.pad(x_f, ((0, batch_p - batch), (0, width_p - width)))

    # ---- choose the depth-chunk size (chunked middle path, gen-aware VMEM budget) ----
    w_itemsize = jnp.dtype(weight_dtype).itemsize
    per_layer_stream = width_p * width_p * w_itemsize + width_p * 4     # weight + bias
    vmem_cap = _vmem_capacity_bytes()
    # ~75% of physical VMEM, minus the (double-buffered) x/state blocks and slack;
    # the weight/bias chunk stream is double-buffered by the pipeline (2x per chunk).
    fixed_bytes = 4 * bt * width_p * 4 + (1 << 20)
    weight_budget = max(int(0.75 * vmem_cap) - fixed_bytes, per_layer_stream)
    max_chunk_by_vmem = max(1, weight_budget // (2 * per_layer_stream))
    target_chunk = max(1, (4 << 20) // per_layer_stream)   # >= ~4 MiB weight DMA per step
    chunk = int(min(depth, max_chunk_by_vmem, target_chunk))
    if max_chunk is not None:
        chunk = max(1, min(chunk, int(max_chunk)))
    # TODO(synk): for widths where even one layer (x2 buffers) overflows VMEM, add
    # K/N tiling of the per-layer matmul instead of relying on chunk=1.

    # Rebalance chunk over the step count to minimize identity-layer padding of depth.
    n_steps = pl.cdiv(depth, chunk)
    chunk = pl.cdiv(depth, n_steps)
    depth_p = n_steps * chunk
    if depth_p != depth:
        # zero weight + zero bias => act(0) = 0 => identity residual layer
        w_t = jnp.pad(w_t, ((0, depth_p - depth), (0, 0), (0, 0)))
        b_f = jnp.pad(b_f, ((0, depth_p - depth), (0, 0), (0, 0)))

    unroll = True if chunk <= 8 else 8
    kernel = functools.partial(_resnet_chunk_kernel, h=float(h), chunk=chunk,
                               unroll=unroll, activation=activation)

    out = pl.pallas_call(
        kernel,
        out_shape=jax.ShapeDtypeStruct((batch_p, width_p), jnp.float32),
        grid=(batch_p // bt, n_steps),
        in_specs=[
            pl.BlockSpec((bt, width_p), lambda bi, s: (bi, 0)),               # x tile
            pl.BlockSpec((chunk, width_p, width_p), lambda bi, s: (s, 0, 0)),  # weights
            pl.BlockSpec((chunk, 1, width_p), lambda bi, s: (s, 0, 0)),        # biases
        ],
        out_specs=pl.BlockSpec((bt, width_p), lambda bi, s: (bi, 0)),          # state
        compiler_params=pltpu.CompilerParams(
            dimension_semantics=("parallel", "arbitrary"),   # state carried across depth
            vmem_limit_bytes=int(0.85 * vmem_cap),
        ),
    )(x_f, w_t, b_f)

    if batch_p != batch or width_p != width:
        out = out[:batch, :width]
    return out


def resnet_reference(x, w_stack, b_stack, h, activation=jnp.tanh):
    """Pure-JAX f32 reference matching the PyTorch forward exactly."""
    x = x.astype(jnp.float32)
    for l in range(w_stack.shape[0]):
        z = x @ w_stack[l].astype(jnp.float32).T + b_stack[l].astype(jnp.float32)
        x = x + h * activation(z)
    return x


if __name__ == "__main__":
    key = jax.random.PRNGKey(0)
    h = 0.1

    def make(cfg_key, batch, width, depth):
        kx, kw, kb = jax.random.split(cfg_key, 3)
        x = jax.random.normal(kx, (batch, width), dtype=jnp.float32)
        # nn.Linear(width, width) weights: (out_features, in_features) per layer.
        w = 0.1 * jax.random.normal(kw, (depth, width, width), dtype=jnp.float32)
        b = 0.1 * jax.random.normal(kb, (depth, width), dtype=jnp.float32)
        return x, w, b

    k1, k2, k3 = jax.random.split(key, 3)

    # 1) aligned config, max_chunk=2 forces a multi-step depth grid (state-carry path).
    x, w, b = make(k1, 8, 128, 4)
    out = jax.block_until_ready(resnet_forward(x, w, b, h, max_chunk=2))
    ref = resnet_reference(x, w, b, h)
    assert out.shape == (8, 128)
    assert jnp.allclose(out, ref, atol=3e-2, rtol=3e-2), "config 1 mismatch vs reference"

    # 2) unaligned config: exercises batch/width padding and identity depth-padding.
    x, w, b = make(k2, 5, 200, 3)
    out = jax.block_until_ready(resnet_forward(x, w, b, h, max_chunk=2))
    ref = resnet_reference(x, w, b, h)
    assert out.shape == (5, 200)
    assert jnp.allclose(out, ref, atol=3e-2, rtol=3e-2), "config 2 mismatch vs reference"

    # 3) larger batch: exercises the leading "parallel" batch-tile grid axis.
    x, w, b = make(k3, 300, 128, 3)
    out = jax.block_until_ready(resnet_forward(x, w, b, h))
    ref = resnet_reference(x, w, b, h)
    assert out.shape == (300, 128)
    assert jnp.allclose(out, ref, atol=3e-2, rtol=3e-2), "config 3 mismatch vs reference"

    print("KERNEL_OK")
</pallas_src>

<mosaic_0001>
module attributes {stable_mosaic.version = 11 : i64} {
  func.func @_resnet_chunk_kernel(%arg0: i32, %arg1: i32, %arg2: memref<8x128xf32, #tpu.memory_space<vmem>>, %arg3: memref<2x128x128xbf16, #tpu.memory_space<vmem>>, %arg4: memref<2x1x128xf32, #tpu.memory_space<vmem>>, %arg5: memref<8x128xf32, #tpu.memory_space<vmem>>) attributes {dimension_semantics = [#tpu.dimension_semantics<parallel>, #tpu.dimension_semantics<arbitrary>], iteration_bounds = array<i64: 1, 2>, scalar_prefetch = 0 : i64, scratch_operands = 0 : i64, tpu.core_type = #tpu.core_type<tc>, window_params = [{transform_indices = @transform_0, window_bounds = array<i64: 8, 128>}, {transform_indices = @transform_1, window_bounds = array<i64: 2, 128, 128>}, {transform_indices = @transform_2, window_bounds = array<i64: 2, 1, 128>}, {transform_indices = @transform_3, window_bounds = array<i64: 8, 128>}]} {
    %c0_i32 = arith.constant 0 : i32
    %0 = arith.cmpi eq, %arg1, %c0_i32 : i32
    %1 = arith.extui %0 : i1 to i32
    %c0_i32_0 = arith.constant 0 : i32
    %2 = arith.cmpi ne, %1, %c0_i32_0 : i32
    scf.if %2 {
      %c0_16 = arith.constant 0 : index
      %c0_17 = arith.constant 0 : index
      %33 = vector.load %arg2[%c0_16, %c0_17] : memref<8x128xf32, #tpu.memory_space<vmem>>, vector<8x128xf32>
      %c0_18 = arith.constant 0 : index
      %c0_19 = arith.constant 0 : index
      %34 = vector.load %arg5[%c0_18, %c0_19] : memref<8x128xf32, #tpu.memory_space<vmem>>, vector<8x128xf32>
      tpu.vector_store %arg5[%c0_18, %c0_19], %33 {strides = array<i32>} : memref<8x128xf32, #tpu.memory_space<vmem>>, vector<8x128xf32>,
    } else {
    }
    %c0 = arith.constant 0 : index
    %c0_1 = arith.constant 0 : index
    %3 = vector.load %arg5[%c0, %c0_1] : memref<8x128xf32, #tpu.memory_space<vmem>>, vector<8x128xf32>
    %c0_i32_2 = arith.constant 0 : i32
    %4 = arith.truncf %3 : vector<8x128xf32> to vector<8x128xbf16>
    %5 = arith.index_cast %c0_i32_2 : i32 to index
    %c0_3 = arith.constant 0 : index
    %c0_4 = arith.constant 0 : index
    %6 = vector.load %arg3[%5, %c0_3, %c0_4] : memref<2x128x128xbf16, #tpu.memory_space<vmem>>, vector<1x128x128xbf16>
    %7 = vector.shape_cast %6 : vector<1x128x128xbf16> to vector<128x128xbf16>
    %cst = arith.constant dense<0.000000e+00> : vector<8x128xf32>
    %8 = tpu.matmul %4, %7, %cst {dimension_numbers = #tpu.dot_dimension_numbers<[1], [0], [0], [1], [0, 0, 1, 1], [], []>} : vector<8x128xbf16>, vector<128x128xbf16>, vector<8x128xf32> -> vector<8x128xf32>
    %9 = arith.index_cast %c0_i32_2 : i32 to index
    %c0_5 = arith.constant 0 : index
    %c0_6 = arith.constant 0 : index
    %10 = vector.load %arg4[%9, %c0_5, %c0_6] : memref<2x1x128xf32, #tpu.memory_space<vmem>>, vector<1x1x128xf32>
    %11 = vector.shape_cast %10 : vector<1x1x128xf32> to vector<1x128xf32>
    %12 = vector.broadcast %11 : vector<1x128xf32> to vector<8x128xf32>
    %13 = arith.addf %8, %12 : vector<8x128xf32>
    %14 = math.tanh %13 : vector<8x128xf32>
    %cst_7 = arith.constant 1.000000e-01 : f32
    %15 = vector.broadcast %cst_7 : f32 to vector<8x128xf32>
    %16 = arith.mulf %15, %14 : vector<8x128xf32>
    %17 = arith.addf %3, %16 : vector<8x128xf32>
    %c1_i32 = arith.constant 1 : i32
    %18 = arith.truncf %17 : vector<8x128xf32> to vector<8x128xbf16>
    %19 = arith.index_cast %c1_i32 : i32 to index
    %c0_8 = arith.constant 0 : index
    %c0_9 = arith.constant 0 : index
    %20 = vector.load %arg3[%19, %c0_8, %c0_9] : memref<2x128x128xbf16, #tpu.memory_space<vmem>>, vector<1x128x128xbf16>
    %21 = vector.shape_cast %20 : vector<1x128x128xbf16> to vector<128x128xbf16>
    %cst_10 = arith.constant dense<0.000000e+00> : vector<8x128xf32>
    %22 = tpu.matmul %18, %21, %cst_10 {dimension_numbers = #tpu.dot_dimension_numbers<[1], [0], [0], [1], [0, 0, 1, 1], [], []>} : vector<8x128xbf16>, vector<128x128xbf16>, vector<8x128xf32> -> vector<8x128xf32>
    %23 = arith.index_cast %c1_i32 : i32 to index
    %c0_11 = arith.constant 0 : index
    %c0_12 = arith.constant 0 : index
    %24 = vector.load %arg4[%23, %c0_11, %c0_12] : memref<2x1x128xf32, #tpu.memory_space<vmem>>, vector<1x1x128xf32>
    %25 = vector.shape_cast %24 : vector<1x1x128xf32> to vector<1x128xf32>
    %26 = vector.broadcast %25 : vector<1x128xf32> to vector<8x128xf32>
    %27 = arith.addf %22, %26 : vector<8x128xf32>
    %28 = math.tanh %27 : vector<8x128xf32>
    %cst_13 = arith.constant 1.000000e-01 : f32
    %29 = vector.broadcast %cst_13 : f32 to vector<8x128xf32>
    %30 = arith.mulf %29, %28 : vector<8x128xf32>
    %31 = arith.addf %17, %30 : vector<8x128xf32>
    %c2_i32 = arith.constant 2 : i32
    %c0_14 = arith.constant 0 : index
    %c0_15 = arith.constant 0 : index
    %32 = vector.load %arg5[%c0_14, %c0_15] : memref<8x128xf32, #tpu.memory_space<vmem>>, vector<8x128xf32>
    tpu.vector_store %arg5[%c0_14, %c0_15], %31 {strides = array<i32>} : memref<8x128xf32, #tpu.memory_space<vmem>>, vector<8x128xf32>,
    return
  }
  func.func @transform_0(%arg0: i32, %arg1: i32) -> (i32, i32) {
    %c0_i32 = arith.constant 0 : i32
    %c0_i32_0 = arith.constant 0 : i32
    return %arg0, %c0_i32 : i32, i32
  }
  func.func @transform_1(%arg0: i32, %arg1: i32) -> (i32, i32, i32) {
    %c0_i32 = arith.constant 0 : i32
    %c0_i32_0 = arith.constant 0 : i32
    %c0_i32_1 = arith.constant 0 : i32
    return %arg1, %c0_i32, %c0_i32_0 : i32, i32, i32
  }
  func.func @transform_2(%arg0: i32, %arg1: i32) -> (i32, i32, i32) {
    %c0_i32 = arith.constant 0 : i32
    %c0_i32_0 = arith.constant 0 : i32
    %c0_i32_1 = arith.constant 0 : i32
    return %arg1, %c0_i32, %c0_i32_0 : i32, i32, i32
  }
  func.func @transform_3(%arg0: i32, %arg1: i32) -> (i32, i32) {
    %c0_i32 = arith.constant 0 : i32
    %c0_i32_0 = arith.constant 0 : i32
    return %arg0, %c0_i32 : i32, i32
  }
}

</mosaic_0001>

<bundles_post_ra>
// kernel: tpu_custom_call.1
= control target key start
LH: loop header
LB: loop body
LE: loop exit
PB: predicated region body
PF: predicated region fallthrough
CT: control target
= control target key end

     0   :  { %8 = vsyncpa [#allocation3], 0  ;;  %s1171_s0 = inlined_call_operand.hbm [shape: f32[8,128], index: 0, kind: input, shape index: {}]   ;;  %s1172_s1 = inlined_call_operand.hbm [shape: bf16[4,128,128], index: 1, kind: input, shape index: {}]   ;;  %s1173_s2 = inlined_call_operand.vmem [shape: f32[4,1,128], index: 2, kind: input, shape index: {}]   ;;  %s1174_s3 = inlined_call_operand.hbm [shape: f32[8,128], index: 3, kind: output, shape index: {}]  }
   0x1   :  { %9 = vsyncpa [#allocation6], 0 }
   0x2   :  { %11 = vsyncpa [#allocation6 + $0x1], 0 }
   0x3   :  { %12 = vsyncpa [#allocation4], 0  ;;  %s949_s12 = smov 0   ;;  %s951_s13 = smov 0  }
   0x4   :  { %s953_s14 = smov 0   ;;  %s955_s15 = smov 0  }
   0x5   :  { %s957_s16 = smov 0   ;;  %s959_s17 = smov 0  }
   0x6 LB: > { %s569_s18 = sadd.s32 4294967295, %s920_s17   ;;  %s63_s19 = sadd.s32 1, %s908_s14  ;;  %s920_s17 = sphi %s959_s17, %s18_s17   ;;  %s916_s16 = sphi %s957_s16, %s1195_s16   ;;  %s912_s15 = sphi %s955_s15, %s1194_s15   ;;  %s908_s14 = sphi %s953_s14, %s1193_s14   ;;  %s904_s13 = sphi %s951_s13, %s1192_s13   ;;  %s900_s12 = sphi %s949_s12, %s1191_s12  }
   0x7   : > { %p70_p0 = scmp.ne.s32.totalorder %s908_s14, %s904_s13  ;;  %p71_p1 = scmp.eq.s32.totalorder %s920_s17, 0 }
   0x8   : > { %p76_p2 = scmp.ne.s32.totalorder %s904_s13, %s900_s12  ;;  %p985_p3 = scmp.eq.s32.totalorder %s569_s18, 0 }
   0x9   : > { %p72_p4 = por %p71_p1, %p70_p0  ;;  %p570_p5 = scmp.ge.s32.totalorder %s920_s17, 1 }
   0xa   : > { %s1180_s20 = scalar_select %p985_p3, 1, 0 }
   0xb   : > { %p992_p6 = por %p985_p3, %p76_p2  ;;  %p139_p7 = scmp.lt.s32.totalorder %s920_s17, 3 }
   0xc   : > { %s922_s23 = smov [#allocation2]   ;;  %p700_p10 = scmp.lt.s32.totalorder %s920_s17, 2 }
   0xd   : > { %s1181_s21 = scalar_select %p992_p6, 1, 0 }
   0xe   : > { %p997_p8 = pnand %p570_p5, %p139_p7  ;;  %s154_s24 = sshll.u32 %s922_s23, 4  ;;  %s155_s24 = int_to_ptr.vmem [resolvable:$true] %s154_s24 }
   0xf   : > { %s165_s25 = sand.u32 1, %s908_s14   ;;  %p1011_p12 = pnand %p700_p10, %p72_p4 }
  0x10   : > { %s1182_s22 = scalar_select %p997_p8, 1, 0 }
  0x11   : > { %p691_p9 = pneg %p997_p8  ;;  %s778_s30 = scalar_lea.hbm %s1171_s0, 128 }
  0x12   : > { %s1184_s27 = scalar_select %p1011_p12, 1, 0 }
  0x13   : > { %p1007_p11 = pnand %p691_p9, %p985_p3  ;;  %p779_p13 = scmp.ne.s32.totalorder %s1171_s0, %s778_s30 }
  0x14   : > { %p785_p5 = scmp.lt.u32.totalorder %s778_s30, %s1171_s0 }
  0x15   : > { %p780_p0 = pneg %p1007_p11 }
  0x17   : > { %p781_p1 = pnand %p780_p0, %p779_p13 }
  0x19   : > { %p782_p2 = pneg %p781_p1 }
  0x1b   : > { %p787_p4 = pnand %p785_p5, %p782_p2 }
  0x1d   : > { %790 = shalt.err (!%p787_p4)
}
  0x1e   : > { %s791_s8 = scalar_lea.vmem %s155_s24, 128  ;;  %p799_p6 = scmp.lt.s32.totalorder %s155_s24, %s155_s24 }
  0x1f   : > { %p792_p7 = scmp.ne.s32.totalorder %s155_s24, %s791_s8  ;;  %p800_p3 = scmp.lt.s32.totalorder %s791_s8, %s791_s8 }
  0x21   : > { %p794_p9 = pnand %p792_p7, %p780_p0  ;;  %p801_p8 = por %p800_p3, %p799_p6 }
  0x23   : > { %p795_p10 = pneg %p794_p9 }
  0x25   : > { %p802_p12 = pnand %p801_p8, %p795_p10 }
  0x27   : > { %805 = shalt.err (!%p802_p12)
}
  0x28   : > { %694 = dma.hbm_to_vmem [thread:$0]  (!%p1007_p11), %s1171_s0, 128, %s155_s24, [#allocation3]  }
  0x29   : > { %s27_s11 = sadd.s32 1, %s916_s16  ;;  %s573_s12 = sshll.u32 %s165_s25, 7 }
  0x2a   : > { %p28_p13 = scmp.ge.s32.totalorder %s27_s11, 2  ;;  %s622_s23 = sshll.u32 %s916_s16, 11 }
  0x2b   : > { %s169_s28 = scalar_lea.vmem [#allocation5], %s573_s12  ;;  %s1040_s4 = scalar_lea.hbm %s1172_s1, %s622_s23 }
  0x2c   : > { %s177_s29 = sshll.u32 %s169_s28, 4  ;;  %s1197_s11 = smov (%p28_p13, %s27_s11), 0  ;;  %s1042_s29 = int_to_ptr.vmem [resolvable:$true] %s177_s29 }
  0x2d   : > { %s60_s24 = ssub.s32 %s916_s16, %s1197_s11  ;;  %s1052_s6 = scalar_lea.sflag [#allocation6], %s165_s25 }
  0x2e   : > { %p1046_p3 = scmp.eq.s32.totalorder %s60_s24, 0  ;;  %s806_s7 = scalar_lea.hbm %s1040_s4, 2048 }
  0x2f   : > { %p807_p6 = scmp.ne.s32.totalorder %s1040_s4, %s806_s7  ;;  %p1186_p8 = scmp.ne.s32.totalorder %s1184_s27, 0 }
  0x30   : > { %s811_s10 = scalar_lea.hbm %s1172_s1, 4096  ;;  %p812_p1 = scmp.lt.u32.totalorder %s1040_s4, %s1172_s1 }
  0x31   : > { %p808_p11 = pneg %p1186_p8  ;;  %p813_p2 = scmp.lt.u32.totalorder %s811_s10, %s806_s7 }
  0x32   : > { %p815_p4 = scmp.lt.u32.totalorder %s806_s7, %s1040_s4 }
  0x33   : > { %p809_p12 = pnand %p808_p11, %p807_p6  ;;  %p814_p5 = por %p813_p2, %p812_p1 }
  0x35   : > { %p810_p0 = pneg %p809_p12  ;;  %p816_p7 = por %p815_p4, %p814_p5 }
  0x37   : > { %p817_p9 = pnand %p816_p7, %p810_p0 }
  0x39   : > { %820 = shalt.err (!%p817_p9)
}
  0x3a   : > { %s821_s25 = scalar_lea.vmem %s1042_s29, 2048  ;;  %s923_s28 = smov [#allocation5]  }
  0x3b   : > { %p822_p10 = scmp.ne.s32.totalorder %s1042_s29, %s821_s25  ;;  %s826_s26 = sshll.u32 %s923_s28, 4  ;;  %s827_s26 = int_to_ptr.vmem [resolvable:$false] %s826_s26 }
  0x3c   : > { %s828_s30 = scalar_lea.vmem %s827_s26, 4096  ;;  %p829_p12 = scmp.lt.s32.totalorder %s1042_s29, %s827_s26 }
  0x3d   : > { %p824_p13 = pnand %p822_p10, %p808_p11  ;;  %p830_p1 = scmp.lt.s32.totalorder %s828_s30, %s821_s25 }
  0x3f   : > { %p825_p6 = pneg %p824_p13  ;;  %p831_p2 = por %p830_p1, %p829_p12 }
  0x41   : > { %p832_p5 = pnand %p831_p2, %p825_p6 }
  0x43   : > { %835 = shalt.err (!%p832_p5)
}
  0x44   : > { %s924_s24 = smov 64   ;;  %s925_s7 = smov 4  }
  0x45   : > { %698 = dma.hbm_to_vmem [thread:$0]  (!%p1186_p8), %s1040_s4, 2048, %s1042_s29, %s1052_s6, %s924_s24, %s924_s24, %s925_s7  }
  0x46   : > { %s1085_s8 = scalar_select %p1046_p3, %s908_s14, %s63_s19  }
  0x47   : > { %p1187_p11 = scmp.ne.s32.totalorder %s1182_s22, 0 }
  0x48   : > { %p1188_p0 = scmp.ne.s32.totalorder (!%p1187_p11), %s1180_s20, 0 }
  0x49   : > { %197 = sbr.rel (%p1187_p11) target bundleno = 602 (0x25a), region = 32 }
  0x50   : > { %887 = dma.done.wait (%p1188_p0), [#allocation3], 128  }
  0x51   : > { %889 = vsyncadd (%p1188_p0), [#allocation3], 4294967168  ;;  %s203_s9 = sand.u32 1, %s904_s13   ;;  %p1189_p8 = scmp.ne.s32.totalorder %s1181_s21, 0 }
  0x52   : > { %s579_s10 = sshll.u32 %s203_s9, 7  ;;  %s204_s12 = scalar_lea.sflag [#allocation6], %s203_s9 }
  0x53   : > { %s1094_s27 = scalar_lea.vmem [#allocation5], %s579_s10 }
  0x54   : > { %891 = dma.done.wait (%p1189_p8), %s204_s12, 2048  }
  0x55   : > { %893 = vsyncadd (%p1189_p8), %s204_s12, 4294965248  ;;  %s580_s19 = sshll.u32 %s912_s15, 1  ;;  %p581_p4 = scmp.ne.s32.totalorder %s912_s15, 0 }
  0x56   : > { %p231_p3 = scmp.lt.s32.totalorder %s580_s19, 3  ;;  %v240_v0 = vld [vmem:[#allocation2] sm:$0xff] (!%p581_p4) }
  0x57   : > { %239 = sbr.rel (%p581_p4) target bundleno = 94 (0x5e), region = 44  ;;  %241 = vst [vmem:[#allocation7] sm:$0xff] (!%p581_p4), %v240_v0 }
  0x58   : > { %s1199_s19 = smov (!%p231_p3, %s580_s19), 3 }
  0x59   : > { %s1104_s20 = scalar_lea.vmem %s1173_s2, %s1199_s19 }
  0x5e PF: > { %v758_v1 = vld [vmem:[%s1094_s27] sm:$0xff]   ;;  %v926_v2 = vmov 0.0   ;;  %v759_v3 = vld [vmem:[%s1094_s27 + $0x8] sm:$0xff]   ;;  %vm927_vm0 = vmmov 0   ;;  %v760_v4 = vld [vmem:[%s1094_s27 + $0x10] sm:$0xff]   ;;  %s928_s15 = smov [#allocation7]  }
  0x5f   : > { %641 = vmatprep.subr.bf16.mxu0 %v926_v2  ;;  %661 = vmatprep.subr.bf16.mxu1 %v926_v2  ;;  %v766_v5 = vld [vmem:[%s1094_s27 + $0x40] sm:$0xff]   ;;  %v761_v6 = vld [vmem:[%s1094_s27 + $0x18] sm:$0xff]   ;;  %v767_v7 = vld [vmem:[%s1094_s27 + $0x48] sm:$0xff]   ;;  %s485_s21 = sshll.u32 %s928_s15, 4  ;;  %p1127_p7 = scmp.eq.s32.totalorder %s569_s18, 1  ;;  %s486_s21 = int_to_ptr.vmem [resolvable:$true] %s485_s21 }
  0x60   : > { %642 = vmatpush3.bf16.msra.mxu0 %v758_v1  ;;  %657 = vmatprep.mubr.msk.bf16.mxu0 %vm927_vm0, %v926_v2  ;;  %v762_v8 = vld [vmem:[%s1094_s27 + $0x20] sm:$0xff]   ;;  %v768_v9 = vld [vmem:[%s1094_s27 + $0x50] sm:$0xff]   ;;  %v763_v10 = vld [vmem:[%s1094_s27 + $0x28] sm:$0xff]   ;;  %s836_s5 = scalar_lea.vmem %s486_s21, 128  ;;  %p843_p6 = scmp.lt.s32.totalorder %s486_s21, %s486_s21 }
  0x61   : > { %643 = vmatprep.subr.bf16.mxu0 %v926_v2  ;;  %677 = vmatprep.mubr.msk.bf16.mxu1 %vm927_vm0, %v926_v2  ;;  %v764_v11 = vld [vmem:[%s1094_s27 + $0x30] sm:$0xff]   ;;  %v765_v12 = vld [vmem:[%s1094_s27 + $0x38] sm:$0xff]   ;;  %v242_v13 = vld [vmem:[#allocation7] sm:$0xff]  ;;  %p837_p9 = scmp.ne.s32.totalorder %s486_s21, %s836_s5  ;;  %p844_p12 = scmp.lt.s32.totalorder %s836_s5, %s836_s5 }
  0x62   : > { %662 = vmatpush3.bf16.msra.mxu1 %v766_v5  ;;  %v243_v14 = vpack.c.bf16 %v242_v13, %v242_v13  ;;  %v769_v15 = vld [vmem:[%s1094_s27 + $0x58] sm:$0xff]   ;;  %v770_v16 = vld [vmem:[%s1094_s27 + $0x60] sm:$0xff]   ;;  %v771_v17 = vld [vmem:[%s1094_s27 + $0x68] sm:$0xff]  }
  0x63   : > { %663 = vmatprep.subr.bf16.mxu1 %v926_v2  ;;  %v772_v18 = vld [vmem:[%s1094_s27 + $0x70] sm:$0xff]   ;;  %v773_v19 = vld [vmem:[%s1094_s27 + $0x78] sm:$0xff]   ;;  %p838_p10 = pnand %p837_p9, %p1127_p7  ;;  %p845_p1 = por %p844_p12, %p843_p6 }
  0x64   : > { %644 = vmatpush3.bf16.msra.mxu0 %v759_v3  ;;  %v582_v20 = vld [vmem:[%s1104_s20] ss:$0 sm:$0xff]  ;;  %v608_v30 = vld [vmem:[%s1104_s20 + $0x1] ss:$0 sm:$0xff] }
  0x65   : > { %645 = vmatprep.subr.bf16.mxu0 %v926_v2  ;;  %p839_p13 = pneg %p838_p10 }
  0x66   : > { %664 = vmatpush3.bf16.msra.mxu1 %v767_v7 }
  0x67   : > { %665 = vmatprep.subr.bf16.mxu1 %v926_v2  ;;  %p846_p2 = pnand %p845_p1, %p839_p13 }
  0x68   : > { %646 = vmatpush3.bf16.msra.mxu0 %v760_v4 }
  0x69   : > { %647 = vmatprep.subr.bf16.mxu0 %v926_v2 }
  0x6a   : > { %666 = vmatpush3.bf16.msra.mxu1 %v768_v9 }
  0x6b   : > { %667 = vmatprep.subr.bf16.mxu1 %v926_v2 }
  0x6c   : > { %648 = vmatpush3.bf16.msra.mxu0 %v761_v6 }
  0x6d   : > { %649 = vmatprep.subr.bf16.mxu0 %v926_v2 }
  0x6e   : > { %668 = vmatpush3.bf16.msra.mxu1 %v769_v15 }
  0x6f   : > { %669 = vmatprep.subr.bf16.mxu1 %v926_v2 }
  0x70   : > { %650 = vmatpush3.bf16.msra.mxu0 %v762_v8 }
  0x71   : > { %651 = vmatprep.subr.bf16.mxu0 %v926_v2 }
  0x72   : > { %670 = vmatpush3.bf16.msra.mxu1 %v770_v16 }
  0x73   : > { %671 = vmatprep.subr.bf16.mxu1 %v926_v2 }
  0x74   : > { %652 = vmatpush3.bf16.msra.mxu0 %v763_v10 }
  0x75   : > { %653 = vmatprep.subr.bf16.mxu0 %v926_v2 }
  0x76   : > { %672 = vmatpush3.bf16.msra.mxu1 %v771_v17 }
  0x77   : > { %673 = vmatprep.subr.bf16.mxu1 %v926_v2 }
  0x78   : > { %654 = vmatpush3.bf16.msra.mxu0 %v764_v11 }
  0x79   : > { %655 = vmatprep.subr.bf16.mxu0 %v926_v2 }
  0x7a   : > { %674 = vmatpush3.bf16.msra.mxu1 %v772_v18 }
  0x7b   : > { %675 = vmatprep.subr.bf16.mxu1 %v926_v2 }
  0x7c   : > { %656 = vmatpush3.bf16.msra.mxu0 %v765_v12 }
  0x7e   : > { %676 = vmatpush3.bf16.msra.mxu1 %v773_v19 }
  0x7f   : > { %658 = vmatmul.mubr.bf16.vlgmr.msra.gmra.mrb[0].mxu0 %v243_v14 }
 0x152   : > { %v349_v21 = vpop.f32.mrb[0].mxu0 }
 0x153   : > { %v350_v22 = vadd.f32 %v582_v20, %v349_v21  ;;  %v659_v23 = vpop.f32.mrb[1].mxu0 }
 0x154   : > { %v352_v24 = vpop.f32.mrb[2].mxu0 }
 0x155   : > { %774 = vtanh.f32 %v350_v22  ;;  %v660_v25 = vpop.f32.mrb[3].mxu0 }
 0x15f   : > { %v775_v26 = vpop.eup %774 }
 0x160   : > { %v356_v27 = vmul.f32 0.1, %v775_v26 }
 0x162   : > { %v357_v28 = vadd.f32 %v356_v27, %v242_v13 }
 0x164   : > { %v358_v29 = vpack.c.bf16 %v357_v28, %v357_v28 }
 0x166   : > { %678 = vmatmul.mubr.bf16.vlgmr.msra.gmra.mrb[0].mxu1 %v358_v29 }
 0x239   : > { %v466_v31 = vpop.f32.mrb[0].mxu1 }
 0x23a   : > { %v467_v32 = vadd.f32 %v608_v30, %v466_v31  ;;  %v679_v33 = vpop.f32.mrb[1].mxu1 }
 0x23b   : > { %v469_v34 = vpop.f32.mrb[2].mxu1 }
 0x23c   : > { %776 = vtanh.f32 %v467_v32  ;;  %v680_v35 = vpop.f32.mrb[3].mxu1 }
 0x246   : > { %v777_v36 = vpop.eup %776 }
 0x247   : > { %v473_v37 = vmul.f32 0.1, %v777_v36 }
 0x249   : > { %v474_v38 = vadd.f32 %v473_v37, %v357_v28 }
 0x24b   : > { %475 = vst [vmem:[#allocation7] sm:$0xff] %v474_v38 }
 0x24c   : > { %849 = shalt.err (!%p846_p2)
}
 0x24d   : > { %s850_s18 = scalar_lea.hbm %s1174_s3, 128 }
 0x24e   : > { %p851_p5 = scmp.ne.s32.totalorder %s1174_s3, %s850_s18  ;;  %p856_p8 = scmp.lt.u32.totalorder %s850_s18, %s1174_s3 }
 0x250   : > { %p852_p11 = pnand %p851_p5, %p1127_p7 }
 0x252   : > { %p853_p0 = pneg %p852_p11 }
 0x254   : > { %p858_p3 = pnand %p856_p8, %p853_p0 }
 0x256   : > { %861 = shalt.err (!%p858_p3)
}
 0x257   : > { %688 = dma.vmem_to_hbm [thread:$0]  (%p1127_p7), %s486_s21, 128, %s1174_s3, [#allocation4]  }
 0x258   : > { %895 = dma.done.wait (%p1127_p7), [#allocation4], 128  }
 0x259   : > { %897 = vsyncadd (%p1127_p7), [#allocation4], 4294967168 }
 0x25a PF: > { %s18_s17 = sadd.s32 1, %s920_s17   ;;  %s1191_s12 = smov %s904_s13 }
 0x25b   : > { %p15_p4 = scmp.ge.s32.totalorder %s18_s17, 4   ;;  %s1192_s13 = smov %s908_s14 }
 0x25c   : > { %s1193_s14 = smov %s1085_s8  ;;  %s1194_s15 = smov %s916_s16 }
 0x25d   : > { %s1195_s16 = smov %s1197_s11  ;;  %17 = sbr.rel (!%p15_p4) target bundleno = 6 (0x6), region = 85 }
 0x264   :  { %498 = vsyncpa [#allocation3], 1 }
 0x265   :  { %500 = vsyncpa [#allocation3 + $0x1], 1 }
 0x266   :  { %501 = vsyncpa [#allocation6], 1 }
 0x267   :  { %503 = vsyncpa [#allocation6 + $0x1], 1 }
 0x268   :  { %504 = vsyncpa [#allocation4], 1 }
 0x269   :  { %506 = vsyncpa [#allocation4 + $0x1], 1 }

</bundles_post_ra>
